<compile_context>
chip_gen: v5e
topology: v5e:2x2
jax: 0.10.0
libtpu: 0.0.40
codegen_flags: <defaults>
</compile_context>

<pallas_src>
import functools

import jax
import jax.numpy as jnp
from jax.experimental import pallas as pl
from jax.experimental.pallas import tpu as pltpu


def _choose_hw_tile(HW, C, itemsize):
    """Pick a lane-dense spatial tile keeping double-buffered input blocks plus
    a handful of (C, T) f32 temporaries well under the smallest scoped-VMEM
    budget (v5e ~16 MiB scoped default)."""
    budget = 12 * 1024 * 1024
    # 2 buffers x (logits + label) blocks + ~6 f32 temporaries of (C, T)
    bytes_per_lane = C * (2 * 2 * itemsize + 6 * 4) + 2 * 2 * 4
    t = budget // max(bytes_per_lane, 1)
    t = max(512, (t // 512) * 512)
    t = min(t, 16384)
    if HW <= t:
        return HW          # one full-extent block: no tail, no masking at all
    return t               # multiple of 512 (hence of 128); ragged tail masked


def _dice_kernel(logits_ref, label_ref, out_ref, numer_ref, denom_ref,
                 *, C, HW, tile_hw, p, smooth, ignore_lb, exact_tiles):
    t = pl.program_id(1)

    # Reset the per-sample accumulators at the first spatial tile.
    @pl.when(t == 0)
    def _():
        numer_ref[...] = jnp.zeros_like(numer_ref)
        denom_ref[...] = jnp.zeros_like(denom_ref)

    logits = logits_ref[0].astype(jnp.float32)     # (C, T)
    lbl = label_ref[0]                             # (1, T) int32

    not_ignored = lbl != ignore_lb                 # (1, T)
    if exact_tiles:
        # Every tile is fully in bounds: the tail mask is compiled out.
        in_bounds = None
        valid = not_ignored
    else:
        # Exact lane mask for the ragged last block (Pallas-padded values are
        # only ever on the discarded side of a select, so they never leak).
        pos = t * tile_hw + jax.lax.broadcasted_iota(jnp.int32, (1, tile_hw), 1)
        in_bounds = pos < HW                       # (1, T)
        valid = in_bounds & not_ignored            # (1, T)

    probs = jax.nn.sigmoid(logits)                 # (C, T) f32 (EUP)

    # numer: probs gathered at the labelled channel of each valid pixel.
    # (No (C, T) one-hot f32 tensor is materialized.)
    chan = jax.lax.broadcasted_iota(jnp.int32, (C, tile_hw), 0)
    match = (chan == lbl) & valid                  # (C, T)
    numer_t = jnp.sum(jnp.where(match, probs, 0.0), keepdims=True)   # (1, 1)

    # denom: sum(probs**p) over real pixels (ignored pixels still count, as in
    # the PyTorch module) + one-hot mass (= number of valid pixels, since
    # one_hot**p == one_hot and each valid pixel contributes exactly 1).
    if p == 1:
        probs_p = probs
    elif p == 2:
        probs_p = probs * probs
    else:
        probs_p = probs ** p                       # general (transcendental) path
    if exact_tiles:
        probs_sum = jnp.sum(probs_p, keepdims=True)
    else:
        probs_sum = jnp.sum(jnp.where(in_bounds, probs_p, 0.0), keepdims=True)
    denom_t = probs_sum + jnp.sum(valid.astype(jnp.float32), keepdims=True)

    # The single cross-lane collapse per tile is a handful of XLU ops vs the
    # hundreds of EUP/VPU vreg ops above -- not binding.
    numer_ref[...] += numer_t
    denom_ref[...] += denom_t

    # Finalize: form the (nonlinear) dice ratio only from the accumulated sums.
    @pl.when(t == pl.num_programs(1) - 1)
    def _():
        numer = numer_ref[...]                     # (1, 1)
        denom = denom_ref[...]                     # (1, 1)
        loss = 1.0 - (2.0 * numer + smooth) / (denom + smooth)
        out_ref[...] = jnp.reshape(loss, (1, 1, 1))


def generalized_soft_dice_loss(logits, label, *, p=1, smooth=1.0,
                               reduction="mean", weight=None, ignore_lb=255,
                               tile_hw=None):
    """logits: (N, C, H, W) float (f32 or bf16); label: (N, H, W) int.

    Returns the scalar mean loss for reduction='mean', else the per-sample
    loss vector of shape (N,) (matching the PyTorch module, which only
    reduces for 'mean')."""
    if weight is not None:
        # TODO(synk): per-class `weight` rescaling needs per-channel numer/denom
        # accumulators; not implemented (module default is weight=None).
        raise NotImplementedError("per-class weight is not supported")

    N, C, H, W = logits.shape
    HW = H * W
    itemsize = jnp.dtype(logits.dtype).itemsize
    if tile_hw is None:
        tile_hw = _choose_hw_tile(HW, C, itemsize)
    else:
        tile_hw = min(int(tile_hw), HW)
        if tile_hw < HW and tile_hw % 128 != 0:
            raise ValueError("tile_hw must be a multiple of 128 or cover HW")
    n_tiles = pl.cdiv(HW, tile_hw)
    exact_tiles = (HW % tile_hw) == 0

    # Trailing-dim collapse reshapes are layout no-ops; no host-side padding.
    logits_f = logits.reshape(N, C, HW)
    label_f = label.astype(jnp.int32).reshape(N, 1, HW)

    kernel = functools.partial(
        _dice_kernel, C=C, HW=HW, tile_hw=tile_hw, p=p,
        smooth=float(smooth), ignore_lb=int(ignore_lb),
        exact_tiles=exact_tiles)

    out = pl.pallas_call(
        kernel,
        out_shape=jax.ShapeDtypeStruct((N, 1, 1), jnp.float32),
        grid_spec=pltpu.PrefetchScalarGridSpec(
            num_scalar_prefetch=0,
            grid=(N, n_tiles),
            in_specs=[
                pl.BlockSpec((1, C, tile_hw), lambda n, t: (n, 0, t)),
                pl.BlockSpec((1, 1, tile_hw), lambda n, t: (n, 0, t)),
            ],
            out_specs=pl.BlockSpec((1, 1, 1), lambda n, t: (n, 0, 0)),
            scratch_shapes=[
                pltpu.VMEM((1, 1), jnp.float32),   # numer accumulator
                pltpu.VMEM((1, 1), jnp.float32),   # denom accumulator
            ],
        ),
        compiler_params=pltpu.CompilerParams(
            dimension_semantics=("parallel", "arbitrary"),
            vmem_limit_bytes=48 * 1024 * 1024,
        ),
    )(logits_f, label_f)

    per_sample = out[:, 0, 0]                      # (N,)
    if reduction == "mean":
        return jnp.mean(per_sample)
    return per_sample


def _reference(logits, label, *, p=1, smooth=1.0, ignore_lb=255):
    """Pure-JAX reference mirroring the PyTorch forward, for verification."""
    logits = logits.astype(jnp.float32)
    N, C, H, W = logits.shape
    ignore = label == ignore_lb
    lbl = jnp.where(ignore, 0, label)
    one_hot = jax.nn.one_hot(lbl, C, axis=1, dtype=jnp.float32)
    one_hot = one_hot * (~ignore)[:, None, :, :].astype(jnp.float32)
    probs = jax.nn.sigmoid(logits)
    numer = jnp.sum(probs * one_hot, axis=(2, 3))
    denom = jnp.sum(probs ** p + one_hot ** p, axis=(2, 3))
    numer = jnp.sum(numer, axis=1)
    denom = jnp.sum(denom, axis=1)
    loss = 1.0 - (2.0 * numer + smooth) / (denom + smooth)
    return jnp.mean(loss)


if __name__ == "__main__":
    key = jax.random.PRNGKey(0)
    k1, k2, k3 = jax.random.split(key, 3)

    # Test 1: aligned spatial size, f32 logits, default p=1.
    N, C, H, W = 2, 4, 16, 16
    logits = jax.random.normal(k1, (N, C, H, W), dtype=jnp.float32)
    label = jax.random.randint(k2, (N, H, W), 0, C, dtype=jnp.int32)
    ignore_mask = jax.random.bernoulli(k3, 0.1, (N, H, W))
    label = jnp.where(ignore_mask, 255, label)

    loss = jax.block_until_ready(
        generalized_soft_dice_loss(logits, label, p=1, smooth=1.0,
                                   reduction="mean", ignore_lb=255))
    ref = jax.block_until_ready(_reference(logits, label, p=1, smooth=1.0,
                                           ignore_lb=255))
    assert jnp.allclose(loss, ref, rtol=1e-5, atol=1e-5), (loss, ref)

    # Test 2: p=2 path (integer-power special case).
    loss2 = jax.block_until_ready(generalized_soft_dice_loss(logits, label, p=2))
    ref2 = jax.block_until_ready(_reference(logits, label, p=2))
    assert jnp.allclose(loss2, ref2, rtol=1e-5, atol=1e-5), (loss2, ref2)

    # Test 3: unaligned spatial size, single full-extent block (no padding,
    # no masking: block last dim equals the array dim).
    k4, k5, k6 = jax.random.split(jax.random.PRNGKey(1), 3)
    N2, C2, H2, W2 = 3, 3, 10, 13
    logits_b = jax.random.normal(k4, (N2, C2, H2, W2), dtype=jnp.float32)
    label_b = jax.random.randint(k5, (N2, H2, W2), 0, C2, dtype=jnp.int32)
    label_b = jnp.where(jax.random.bernoulli(k6, 0.1, (N2, H2, W2)), 255, label_b)

    loss3 = jax.block_until_ready(generalized_soft_dice_loss(logits_b, label_b))
    ref3 = jax.block_until_ready(_reference(logits_b, label_b))
    assert jnp.allclose(loss3, ref3, rtol=1e-5, atol=1e-5), (loss3, ref3)

    # Test 4: bf16 logits in HBM (bandwidth path); in-kernel f32 math.
    loss4 = jax.block_until_ready(
        generalized_soft_dice_loss(logits_b.astype(jnp.bfloat16), label_b))
    assert jnp.allclose(loss4, ref3, rtol=2e-2, atol=2e-2), (loss4, ref3)

    # Test 5: forced small tile with ragged last block (exercises the
    # no-host-pad partial-boundary masking path).
    k7, k8, k9 = jax.random.split(jax.random.PRNGKey(2), 3)
    N3, C3, H3, W3 = 2, 5, 33, 37              # HW = 1221, tile 512 -> ragged tail
    logits_c = jax.random.normal(k7, (N3, C3, H3, W3), dtype=jnp.float32)
    label_c = jax.random.randint(k8, (N3, H3, W3), 0, C3, dtype=jnp.int32)
    label_c = jnp.where(jax.random.bernoulli(k9, 0.1, (N3, H3, W3)), 255, label_c)

    loss5 = jax.block_until_ready(
        generalized_soft_dice_loss(logits_c, label_c, tile_hw=512))
    ref5 = jax.block_until_ready(_reference(logits_c, label_c))
    assert jnp.allclose(loss5, ref5, rtol=1e-5, atol=1e-5), (loss5, ref5)

    print("KERNEL_OK")
</pallas_src>

<mosaic_0001>
module attributes {stable_mosaic.version = 11 : i64} {
  func.func @_dice_kernel(%arg0: i32, %arg1: i32, %arg2: memref<1x4x256xf32, #tpu.memory_space<vmem>>, %arg3: memref<1x1x256xi32, #tpu.memory_space<vmem>>, %arg4: memref<1x1x1xf32, #tpu.memory_space<vmem>>, %arg5: memref<1x1xf32, #tpu.memory_space<vmem>>, %arg6: memref<1x1xf32, #tpu.memory_space<vmem>>) attributes {dimension_semantics = [#tpu.dimension_semantics<parallel>, #tpu.dimension_semantics<arbitrary>], iteration_bounds = array<i64: 2, 1>, scalar_prefetch = 0 : i64, scratch_operands = 2 : i64, tpu.core_type = #tpu.core_type<tc>, window_params = [{transform_indices = @transform_0, window_bounds = array<i64: 1, 4, 256>}, {transform_indices = @transform_1, window_bounds = array<i64: 1, 1, 256>}, {transform_indices = @transform_2, window_bounds = array<i64: 1, 1, 1>}]} {
    %c0_i32 = arith.constant 0 : i32
    %0 = arith.cmpi eq, %arg1, %c0_i32 : i32
    %1 = arith.extui %0 : i1 to i32
    %c0_i32_0 = arith.constant 0 : i32
    %2 = arith.cmpi ne, %1, %c0_i32_0 : i32
    scf.if %2 {
      %cst_20 = arith.constant 0.000000e+00 : f32
      %48 = vector.broadcast %cst_20 : f32 to vector<1x1xf32>
      %c0_21 = arith.constant 0 : index
      %c0_22 = arith.constant 0 : index
      %49 = vector.load %arg5[%c0_21, %c0_22] : memref<1x1xf32, #tpu.memory_space<vmem>>, vector<1x1xf32>
      tpu.vector_store %arg5[%c0_21, %c0_22], %48 {strides = array<i32>} : memref<1x1xf32, #tpu.memory_space<vmem>>, vector<1x1xf32>,
      %cst_23 = arith.constant 0.000000e+00 : f32
      %50 = vector.broadcast %cst_23 : f32 to vector<1x1xf32>
      %c0_24 = arith.constant 0 : index
      %c0_25 = arith.constant 0 : index
      %51 = vector.load %arg6[%c0_24, %c0_25] : memref<1x1xf32, #tpu.memory_space<vmem>>, vector<1x1xf32>
      tpu.vector_store %arg6[%c0_24, %c0_25], %50 {strides = array<i32>} : memref<1x1xf32, #tpu.memory_space<vmem>>, vector<1x1xf32>,
    } else {
    }
    %c0 = arith.constant 0 : index
    %c0_1 = arith.constant 0 : index
    %c0_2 = arith.constant 0 : index
    %3 = vector.load %arg2[%c0, %c0_1, %c0_2] : memref<1x4x256xf32, #tpu.memory_space<vmem>>, vector<1x4x256xf32>
    %4 = vector.shape_cast %3 : vector<1x4x256xf32> to vector<4x256xf32>
    %c0_3 = arith.constant 0 : index
    %c0_4 = arith.constant 0 : index
    %c0_5 = arith.constant 0 : index
    %5 = vector.load %arg3[%c0_3, %c0_4, %c0_5] : memref<1x1x256xi32, #tpu.memory_space<vmem>>, vector<1x1x256xi32>
    %6 = vector.shape_cast %5 : vector<1x1x256xi32> to vector<1x256xi32>
    %c255_i32 = arith.constant 255 : i32
    %7 = vector.broadcast %c255_i32 : i32 to vector<1x256xi32>
    %8 = arith.cmpi ne, %6, %7 : vector<1x256xi32>
    %9 = arith.negf %4 : vector<4x256xf32>
    %10 = math.exp %9 : vector<4x256xf32>
    %cst = arith.constant 1.000000e+00 : f32
    %11 = vector.broadcast %cst : f32 to vector<4x256xf32>
    %12 = arith.addf %11, %10 : vector<4x256xf32>
    %13 = arith.divf %11, %12 : vector<4x256xf32>
    %14 = tpu.iota {dimensions = array<i32: 0>} : vector<4x256xi32>
    %15 = vector.broadcast %6 : vector<1x256xi32> to vector<4x256xi32>
    %16 = arith.cmpi eq, %14, %15 : vector<4x256xi32>
    %17 = vector.broadcast %8 : vector<1x256xi1> to vector<4x256xi1>
    %18 = arith.andi %16, %17 : vector<4x256xi1>
    %cst_6 = arith.constant 0.000000e+00 : f32
    %19 = vector.broadcast %cst_6 : f32 to vector<4x256xf32>
    %20 = arith.select %18, %13, %19 : vector<4x256xi1>, vector<4x256xf32>
    %21 = vector.shape_cast %20 : vector<4x256xf32> to vector<1x4x256xf32>
    %cst_7 = arith.constant dense<0.000000e+00> : vector<1xf32>
    %22 = vector.multi_reduction <add>, %21, %cst_7 [1, 2] : vector<1x4x256xf32> to vector<1xf32>
    %23 = vector.shape_cast %22 : vector<1xf32> to vector<1x1x1xf32>
    %24 = vector.extract %23[0, 0, 0] : f32 from vector<1x1x1xf32>
    %25 = vector.broadcast %24 : f32 to vector<1x1xf32>
    %26 = vector.shape_cast %13 : vector<4x256xf32> to vector<1x4x256xf32>
    %cst_8 = arith.constant dense<0.000000e+00> : vector<1xf32>
    %27 = vector.multi_reduction <add>, %26, %cst_8 [1, 2] : vector<1x4x256xf32> to vector<1xf32>
    %28 = vector.shape_cast %27 : vector<1xf32> to vector<1x1x1xf32>
    %29 = vector.extract %28[0, 0, 0] : f32 from vector<1x1x1xf32>
    %30 = vector.broadcast %29 : f32 to vector<1x1xf32>
    %31 = arith.extui %8 : vector<1x256xi1> to vector<1x256xi32>
    %32 = arith.sitofp %31 : vector<1x256xi32> to vector<1x256xf32>
    %33 = vector.shape_cast %32 : vector<1x256xf32> to vector<1x1x256xf32>
    %cst_9 = arith.constant dense<0.000000e+00> : vector<1xf32>
    %34 = vector.multi_reduction <add>, %33, %cst_9 [1, 2] : vector<1x1x256xf32> to vector<1xf32>
    %35 = vector.shape_cast %34 : vector<1xf32> to vector<1x1x1xf32>
    %36 = vector.extract %35[0, 0, 0] : f32 from vector<1x1x1xf32>
    %37 = vector.broadcast %36 : f32 to vector<1x1xf32>
    %38 = arith.addf %30, %37 : vector<1x1xf32>
    %c0_10 = arith.constant 0 : index
    %c0_11 = arith.constant 0 : index
    %39 = vector.load %arg5[%c0_10, %c0_11] : memref<1x1xf32, #tpu.memory_space<vmem>>, vector<1x1xf32>
    %40 = arith.addf %39, %25 : vector<1x1xf32>
    %c0_12 = arith.constant 0 : index
    %c0_13 = arith.constant 0 : index
    %41 = vector.load %arg5[%c0_12, %c0_13] : memref<1x1xf32, #tpu.memory_space<vmem>>, vector<1x1xf32>
    tpu.vector_store %arg5[%c0_12, %c0_13], %40 {strides = array<i32>} : memref<1x1xf32, #tpu.memory_space<vmem>>, vector<1x1xf32>,
    %c0_14 = arith.constant 0 : index
    %c0_15 = arith.constant 0 : index
    %42 = vector.load %arg6[%c0_14, %c0_15] : memref<1x1xf32, #tpu.memory_space<vmem>>, vector<1x1xf32>
    %43 = arith.addf %42, %38 : vector<1x1xf32>
    %c0_16 = arith.constant 0 : index
    %c0_17 = arith.constant 0 : index
    %44 = vector.load %arg6[%c0_16, %c0_17] : memref<1x1xf32, #tpu.memory_space<vmem>>, vector<1x1xf32>
    tpu.vector_store %arg6[%c0_16, %c0_17], %43 {strides = array<i32>} : memref<1x1xf32, #tpu.memory_space<vmem>>, vector<1x1xf32>,
    %c0_i32_18 = arith.constant 0 : i32
    %45 = arith.cmpi eq, %arg1, %c0_i32_18 : i32
    %46 = arith.extui %45 : i1 to i32
    %c0_i32_19 = arith.constant 0 : i32
    %47 = arith.cmpi ne, %46, %c0_i32_19 : i32
    scf.if %47 {
      %c0_20 = arith.constant 0 : index
      %c0_21 = arith.constant 0 : index
      %48 = vector.load %arg5[%c0_20, %c0_21] : memref<1x1xf32, #tpu.memory_space<vmem>>, vector<1x1xf32>
      %c0_22 = arith.constant 0 : index
      %c0_23 = arith.constant 0 : index
      %49 = vector.load %arg6[%c0_22, %c0_23] : memref<1x1xf32, #tpu.memory_space<vmem>>, vector<1x1xf32>
      %cst_24 = arith.constant 2.000000e+00 : f32
      %50 = vector.broadcast %cst_24 : f32 to vector<1x1xf32>
      %51 = arith.mulf %50, %48 : vector<1x1xf32>
      %cst_25 = arith.constant 1.000000e+00 : f32
      %52 = vector.broadcast %cst_25 : f32 to vector<1x1xf32>
      %53 = arith.addf %51, %52 : vector<1x1xf32>
      %cst_26 = arith.constant 1.000000e+00 : f32
      %54 = vector.broadcast %cst_26 : f32 to vector<1x1xf32>
      %55 = arith.addf %49, %54 : vector<1x1xf32>
      %56 = arith.divf %53, %55 : vector<1x1xf32>
      %cst_27 = arith.constant 1.000000e+00 : f32
      %57 = vector.broadcast %cst_27 : f32 to vector<1x1xf32>
      %58 = arith.subf %57, %56 : vector<1x1xf32>
      %59 = vector.shape_cast %58 : vector<1x1xf32> to vector<1x1x1xf32>
      %c0_28 = arith.constant 0 : index
      %c0_29 = arith.constant 0 : index
      %c0_30 = arith.constant 0 : index
      %60 = vector.load %arg4[%c0_28, %c0_29, %c0_30] : memref<1x1x1xf32, #tpu.memory_space<vmem>>, vector<1x1x1xf32>
      tpu.vector_store %arg4[%c0_28, %c0_29, %c0_30], %59 {strides = array<i32>} : memref<1x1x1xf32, #tpu.memory_space<vmem>>, vector<1x1x1xf32>,
    } else {
    }
    return
  }
  func.func @transform_0(%arg0: i32, %arg1: i32) -> (i32, i32, i32) {
    %c0_i32 = arith.constant 0 : i32
    %c0_i32_0 = arith.constant 0 : i32
    return %arg0, %c0_i32, %arg1 : i32, i32, i32
  }
  func.func @transform_1(%arg0: i32, %arg1: i32) -> (i32, i32, i32) {
    %c0_i32 = arith.constant 0 : i32
    %c0_i32_0 = arith.constant 0 : i32
    return %arg0, %c0_i32, %arg1 : i32, i32, i32
  }
  func.func @transform_2(%arg0: i32, %arg1: i32) -> (i32, i32, i32) {
    %c0_i32 = arith.constant 0 : i32
    %c0_i32_0 = arith.constant 0 : i32
    %c0_i32_1 = arith.constant 0 : i32
    return %arg0, %c0_i32, %c0_i32_0 : i32, i32, i32
  }
}

</mosaic_0001>

<bundles_post_ra>
// kernel: tpu_custom_call.1
= control target key start
LH: loop header
LB: loop body
LE: loop exit
PB: predicated region body
PF: predicated region fallthrough
CT: control target
= control target key end

     0   :  { %7 = vsyncpa [#allocation5], 0  ;;  %s786_s0 = inlined_call_operand.hbm [shape: f32[2,4,256], index: 0, kind: input, shape index: {}]   ;;  %s787_s1 = inlined_call_operand.hbm [shape: s32[2,1,256], index: 1, kind: input, shape index: {}]   ;;  %s788_s2 = inlined_call_operand.vmem [shape: f32[2,1,1], index: 2, kind: output, shape index: {}]  }
   0x1   :  { %9 = vsyncpa [#allocation5 + $0x1], 0 }
   0x2   :  { %10 = vsyncpa [#allocation7], 0 }
   0x3   :  { %12 = vsyncpa [#allocation7 + $0x1], 0  ;;  %s675_s9 = smov 0   ;;  %s677_s10 = smov 0  }
   0x4   :  { %s679_s11 = smov 0   ;;  %s681_s12 = smov 0  }
   0x5   :  { %s683_s13 = smov 0   ;;  %s685_s14 = smov 0  }
   0x6 LB: > { %s451_s15 = sadd.s32 4294967295, %s656_s14   ;;  %s30_s16 = sadd.s32 1, %s652_s13  ;;  %s656_s14 = sphi %s685_s14, %s18_s14   ;;  %s652_s13 = sphi %s683_s13, %s796_s13   ;;  %s648_s12 = sphi %s681_s12, %s795_s12   ;;  %s644_s11 = sphi %s679_s11, %s794_s11   ;;  %s640_s10 = sphi %s677_s10, %s793_s10   ;;  %s636_s9 = sphi %s675_s9, %s792_s9  }
   0x7   : > { %p32_p0 = scmp.ge.s32.totalorder %s30_s16, 2  ;;  %s39_s17 = sadd.s32 1, %s644_s11 }
   0x8   : > { %p46_p1 = scmp.ne.s32.totalorder %s644_s11, %s640_s10  ;;  %p47_p2 = scmp.eq.s32.totalorder %s656_s14, 0 }
   0x9   : > { %s798_s16 = smov (%p32_p0, %s30_s16), 0  ;;  %p52_p4 = scmp.ne.s32.totalorder %s640_s10, %s636_s9 }
   0xa   : > { %p711_p3 = por %p47_p2, %p46_p1  ;;  %s34_s19 = ssub.s32 %s652_s13, %s798_s16 }
   0xb   : > { %p53_p5 = scmp.eq.s32.totalorder %s451_s15, 0  ;;  %p37_p6 = scmp.eq.s32.totalorder %s34_s19, 0 }
   0xc   : > { %p485_p8 = scmp.lt.s32.totalorder %s656_s14, 2  ;;  %s130_s22 = sand.u32 1, %s644_s11  }
   0xd   : > { %p718_p7 = por %p53_p5, %p52_p4  ;;  %s467_s23 = sshll.u32 %s652_s13, 3 }
   0xe   : > { %s724_s21 = scalar_select %p37_p6, %s644_s11, %s39_s17  }
   0xf   : > { %s455_s24 = sshll.u32 %s130_s22, 3  ;;  %s141_s27 = scalar_lea.hbm %s786_s0, %s467_s23 }
  0x10   : > { %s143_s28 = sshll.u32 %s141_s27, 4  ;;  %s134_s29 = scalar_lea.vmem [#allocation4], %s455_s24  ;;  %s144_s28 = int_to_ptr.hbm [resolvable:$true] %s143_s28 }
  0x11   : > { %s145_s30 = sshll.u32 %s134_s29, 4  ;;  %p733_p9 = pnand %p485_p8, %p711_p3  ;;  %s146_s30 = int_to_ptr.vmem [resolvable:$true] %s145_s30 }
  0x12   : > { %p460_p10 = scmp.ge.s32.totalorder %s656_s14, 1  ;;  %p171_p11 = scmp.lt.s32.totalorder %s656_s14, 3 }
  0x13   : > { %s458_s4 = sshll.u32 %s130_s22, 1  ;;  %s131_s5 = scalar_lea.sflag [#allocation5], %s130_s22 }
  0x14   : > { %481 = dma.hbm_to_vmem [thread:$0]  (!%p733_p9), %s144_s28, 128, %s146_s30, %s131_s5  }
  0x15   : > { %p172_p12 = pnand %p460_p10, %p171_p11  ;;  %s459_s6 = sshll.u32 %s652_s13, 1 }
  0x16   : > { %s156_s7 = scalar_lea.vmem [#allocation6], %s458_s4  ;;  %s162_s17 = scalar_lea.hbm %s787_s1, %s459_s6 }
  0x17   : > { %s166_s8 = sshll.u32 %s156_s7, 4  ;;  %s164_s18 = sshll.u32 %s162_s17, 4  ;;  %s167_s8 = int_to_ptr.vmem [resolvable:$true] %s166_s8  ;;  %s165_s18 = int_to_ptr.hbm [resolvable:$true] %s164_s18 }
  0x18   : > { %s153_s19 = scalar_lea.sflag [#allocation7], %s130_s22  ;;  %175 = sbr.rel (%p172_p12) target bundleno = 298 (0x12a), region = 28 }
  0x19   : > { %484 = dma.hbm_to_vmem [thread:$0]  (!%p733_p9), %s165_s18, 32, %s167_s8, %s153_s19  }
  0x1a   : > { %s177_s23 = sand.u32 (!%p172_p12), 1, %s640_s10  }
  0x1b   : > { %s461_s24 = sshll.u32 (!%p172_p12), %s177_s23, 3  ;;  %s178_s25 = scalar_lea.sflag (!%p172_p12), [#allocation5], %s177_s23 }
  0x1c   : > { %s181_s26 = scalar_lea.vmem (!%p172_p12), [#allocation4], %s461_s24 }
  0x1d   : > { %627 = dma.done.wait (%p718_p7), %s178_s25, 128  }
  0x1e   : > { %629 = vsyncadd (%p718_p7), %s178_s25, 4294967168  ;;  %s462_s27 = sshll.u32 %s177_s23, 1  ;;  %s188_s28 = scalar_lea.sflag [#allocation7], %s177_s23 }
  0x1f   : > { %s191_s29 = scalar_lea.vmem [#allocation6], %s462_s27 }
  0x20   : > { %631 = dma.done.wait (%p718_p7), %s188_s28, 32  }
  0x21   : > { %633 = vsyncadd (%p718_p7), %s188_s28, 4294967264  ;;  %v228_v0 = vld [vmem:[%s181_s26] sm:$0xff]  ;;  %v229_v1 = vld [vmem:[%s191_s29] sm:$0x3]  ;;  %v658_v3 = vmov 0.0   ;;  %vm309_vm1 = vcmask 1040384   ;;  %v250_v17 = vlaneseq }
  0x22   : > { %v463_v2 = vmul.f32 -1.442695, %v228_v0  ;;  %vm230_vm0 = vcmp.ne.s32.totalorder %v229_v1, 255  ;;  %vm225_vm2 = vcmask 0   ;;  %v659_v19 = vmov 0   ;;  %p218_p13 = scmp.lt.s32.totalorder %s648_s12, 1 }
  0x23   : > { %v464_v4 = vsel %vm230_vm0, 1.0, %v658_v3  ;;  %226 = vst.msk [vmem:[#allocation2] sm:$0x1] %vm225_vm2, %v658_v3  ;;  %v256_v20 = vsel %vm230_vm0, 1, %v659_v19  ;;  %v251_v23 = vshrl.u32 %v250_v17, 7  ;;  %v252_v24 = vperm.slane %v229_v1, 0 }
  0x24   : > { %536 = vpow2.f32 %v463_v2  ;;  %v305_v5 = vperm.slane %v464_v4, 0  ;;  %v306_v6 = vperm.slane %v464_v4, 1  ;;  %227 = vst.msk [vmem:[#allocation3] sm:$0x1] %vm225_vm2, %v658_v3  ;;  %v257_v25 = vperm.slane %v256_v20, 0  ;;  %s800_s12 = smov (!%p218_p13, %s648_s12), 1 }
  0x25   : > { %v253_v27 = vperm.slane %v229_v1, 1  ;;  %v258_v28 = vperm.slane %v256_v20, 1  ;;  %vm254_vm7 = vcmp.eq.s32.totalorder %v251_v23, %v252_v24  ;;  %vm271_vm13 = vcmask 1043456   ;;  %s220_s5 = scalar_lea.vmem %s788_s2, %s800_s12 }
  0x26   : > { %v310_v7 = vsel %vm309_vm1, %v305_v5, 0.0  ;;  %v311_v8 = vsel %vm309_vm1, %v306_v6, 0.0  ;;  %vm259_vm8 = vcmp.eq.s32.totalorder %v257_v25, 1 }
  0x27   : > { %v312_v10 = vadd.f32 %v311_v8, %v310_v7  ;;  %vm255_vm9 = vcmp.eq.s32.totalorder %v251_v23, %v253_v27  ;;  %vm260_vm10 = vcmp.eq.s32.totalorder %v258_v28, 1  ;;  %vm261_vm11 = vmand %vm254_vm7, %vm259_vm8 }
  0x28   : > { %vm262_vm12 = vmand %vm255_vm9, %vm260_vm10 }
  0x29   : > { %313 = vadd.xlane.f32.xlu1 %v312_v10 }
  0x2a   : > { %v537_v9 = vpop.eup %536  ;;  %v324_v63 = vld [vmem:[#allocation2] sm:$0x1] }
  0x2b   : > { %v234_v11 = vadd.f32 1.0, %v537_v9  ;;  %v328_v4 = vld [vmem:[#allocation3] sm:$0x1] }
  0x2d   : > { %538 = vrcp.f32 %v234_v11  ;;  %v246_v14 = vand.u32 2147483648, %v234_v11  ;;  %vm240_vm3 = vweird.f32 %v234_v11  ;;  %v244_v16 = vand.u32 2147483647, %v234_v11 }
  0x2f   : > { %v247_v21 = vor.u32 1.1754944e-38, %v246_v14  ;;  %vm245_vm6 = vcmp.eq.f32.partialorder %v244_v16, 8.507059e+37 }
  0x33   : > { %v539_v12 = vpop.eup %538 }
  0x34   : > { %v236_v13 = vmul.f32 %v539_v12, %v234_v11  ;;  %vm241_vm4 = vweird.f32 %v539_v12 }
  0x35   : > { %vm242_vm5 = vmor %vm240_vm3, %vm241_vm4 }
  0x36   : > { %v237_v15 = vsub.f32 1.0, %v236_v13 }
  0x38   : > { %v238_v18 = vmul.f32 %v539_v12, %v237_v15 }
  0x3a   : > { %v239_v22 = vadd.f32 %v539_v12, %v238_v18 }
  0x3c   : > { %v243_v26 = vsel %vm242_vm5, %v539_v12, %v239_v22 }
  0x3d   : > { %v248_v29 = vsel %vm245_vm6, %v247_v21, %v243_v26 }
  0x3e   : > { %264 = vst [vmem:[#allocation1] ss:$2 sm:$0xff] %v248_v29 }
  0x45   : > { %v265_v30 = vld.sshfl [vmem:[#allocation1] sm:$0xff pattern:$0x75316420]  ;;  %v266_v31 = vld.sshfl [vmem:[#allocation1 + $0x8] sm:$0xff pattern:$0x75316420] }
  0x46   : > { %v269_v32 = vsel %vm261_vm11, %v265_v30, 0.0  ;;  %v270_v33 = vsel %vm262_vm12, %v266_v31, 0.0  ;;  %285 = vst [vmem:[#allocation1] ss:$2 sm:$0xff] %v248_v29 }
  0x47   : > { %v272_v34 = vsel %vm271_vm13, %v269_v32, 0.0  ;;  %v273_v35 = vsel %vm271_vm13, %v270_v33, 0.0 }
  0x48   : > { %v274_v36 = vadd.f32 %v273_v35, %v272_v34 }
  0x4a   : > { %275 = vadd.xlane.f32.xlu0 %v274_v36 }
  0x4d   : > { %v286_v37 = vld.sshfl [vmem:[#allocation1] sm:$0xff pattern:$0x75316420]  ;;  %v287_v38 = vld.sshfl [vmem:[#allocation1 + $0x8] sm:$0xff pattern:$0x75316420] }
  0x4e   : > { %v290_v39 = vsel %vm271_vm13, %v286_v37, 0.0  ;;  %v291_v40 = vsel %vm271_vm13, %v287_v38, 0.0 }
  0x4f   : > { %v292_v41 = vadd.f32 %v291_v40, %v290_v39 }
  0x52   : > { %293 = vadd.xlane.f32.xlu0 %v292_v41 }
  0x9c   : > { %v314_v42 = vpop.xlane.xlu1 %313 }
  0x9d   : > { %v315_v44 = vrot.slane %v314_v42, 4 }
  0x9f   : > { %v316_v47 = vadd.f32 %v315_v44, %v314_v42 }
  0xa1   : > { %v317_v50 = vrot.slane %v316_v47, 2 }
  0xa3   : > { %v318_v56 = vadd.f32 %v317_v50, %v316_v47 }
  0xa5   : > { %v319_v59 = vrot.slane %v318_v56, 1 }
  0xa7   : > { %v320_v62 = vadd.f32 %v319_v59, %v318_v56 }
  0xbd   : > { %v276_v43 = vpop.xlane.xlu0 %275 }
  0xbe   : > { %v277_v45 = vrot.slane %v276_v43, 4 }
  0xc0   : > { %v278_v46 = vadd.f32 %v277_v45, %v276_v43 }
  0xc2   : > { %v279_v48 = vrot.slane %v278_v46, 2 }
  0xc4   : > { %v280_v49 = vadd.f32 %v279_v48, %v278_v46 }
  0xc5   : > { %v294_v51 = vpop.xlane.xlu0 %293 }
  0xc6   : > { %v295_v52 = vrot.slane %v294_v51, 4  ;;  %v281_v53 = vrot.slane %v280_v49, 1 }
  0xc8   : > { %v296_v54 = vadd.f32 %v295_v52, %v294_v51  ;;  %v282_v55 = vadd.f32 %v281_v53, %v280_v49 }
  0xca   : > { %v297_v57 = vrot.slane %v296_v54, 2  ;;  %468 = vpush %v282_v55 }
  0xcc   : > { %v298_v58 = vadd.f32 %v297_v57, %v296_v54 }
  0xce   : > { %v299_v60 = vrot.slane %v298_v58, 1 }
  0xd0   : > { %v300_v61 = vadd.f32 %v299_v60, %v298_v58 }
  0xd2   : > { %470 = vpush %v300_v61 }
  0xd3   : > { %472 = vpush %v320_v62 }
  0xfb   : > { %s469_s20 = spop %468 }
  0xfc   : > { %v284_v0 = vstv %s469_s20 }
  0xfd   : > { %v325_v1 = vadd.f32 %v324_v63, %v284_v0 }
  0xff   : > { %327 = vst.msk [vmem:[#allocation2] sm:$0x1] %vm225_vm2, %v325_v1 }
 0x103   : > { %s471_s22 = spop %470 }
 0x104   : > { %v302_v2 = vstv %s471_s22  ;;  %s473_s30 = spop %472 }
 0x105   : > { %v322_v3 = vstv %s473_s30 }
 0x106   : > { %v323_v5 = vadd.f32 %v322_v3, %v302_v2  ;;  %v334_v11 = vld [vmem:[#allocation2] sm:$0x1] }
 0x107   : > { %v336_v14 = vmul.f32 2.0, %v334_v11 }
 0x108   : > { %v329_v6 = vadd.f32 %v328_v4, %v323_v5 }
 0x109   : > { %v337_v19 = vadd.f32 1.0, %v336_v14 }
 0x10a   : > { %330 = vst.msk [vmem:[#allocation3] sm:$0x1] %vm225_vm2, %v329_v6 }
 0x111   : > { %v335_v7 = vld [vmem:[#allocation3] sm:$0x1] }
 0x112   : > { %v338_v8 = vadd.f32 1.0, %v335_v7 }
 0x114   : > { %540 = vrcp.f32 %v338_v8  ;;  %v350_v13 = vand.u32 2147483648, %v338_v8  ;;  %v348_v16 = vand.u32 2147483647, %v338_v8  ;;  %vm344_vm15 = vweird.f32 %v338_v8 }
 0x116   : > { %v351_v18 = vor.u32 1.1754944e-38, %v350_v13  ;;  %vm349_vm1 = vcmp.eq.f32.partialorder %v348_v16, 8.507059e+37 }
 0x11a   : > { %v541_v9 = vpop.eup %540 }
 0x11b   : > { %v340_v10 = vmul.f32 %v541_v9, %v338_v8  ;;  %vm345_vm14 = vweird.f32 %v541_v9 }
 0x11c   : > { %vm346_vm0 = vmor %vm344_vm15, %vm345_vm14 }
 0x11d   : > { %v341_v12 = vsub.f32 1.0, %v340_v10 }
 0x11f   : > { %v342_v15 = vmul.f32 %v541_v9, %v341_v12 }
 0x121   : > { %v343_v17 = vadd.f32 %v541_v9, %v342_v15 }
 0x123   : > { %v347_v20 = vsel %vm346_vm0, %v541_v9, %v343_v17 }
 0x124   : > { %v352_v21 = vsel %vm349_vm1, %v351_v18, %v347_v20 }
 0x125   : > { %v353_v22 = vmul.f32 %v352_v21, %v337_v19 }
 0x127   : > { %v354_v23 = vsub.f32 1.0, %v353_v22 }
 0x129   : > { %355 = vst.msk [vmem:[%s220_s5] sm:$0x1] %vm225_vm2, %v354_v23 }
 0x12a PF: > { %s18_s14 = sadd.s32 1, %s656_s14   ;;  %s792_s9 = smov %s640_s10 }
 0x12b   : > { %p15_p0 = scmp.ge.s32.totalorder %s18_s14, 4   ;;  %s793_s10 = smov %s644_s11 }
 0x12c   : > { %s794_s11 = smov %s724_s21  ;;  %s795_s12 = smov %s652_s13 }
 0x12d   : > { %s796_s13 = smov %s798_s16  ;;  %17 = sbr.rel (!%p15_p0) target bundleno = 6 (0x6), region = 89 }
 0x132   :  { %373 = vsyncpa [#allocation5], 1 }
 0x133   :  { %375 = vsyncpa [#allocation5 + $0x1], 1 }
 0x134   :  { %376 = vsyncpa [#allocation7], 1 }
 0x135   :  { %378 = vsyncpa [#allocation7 + $0x1], 1 }

</bundles_post_ra>
